<compile_context>
chip_gen: v6e
topology: v6e:2x2x1
jax: 0.10.0
libtpu: 0.0.40
codegen_flags: <defaults>
</compile_context>

<pallas_src>
import functools

import jax
import jax.numpy as jnp
from jax.experimental import pallas as pl
from jax.experimental.pallas import tpu as pltpu


def maxout_linear_kernel(x_ref, w_ref, b_ref, o_ref):
    """x: (TB, K); w: (K, 2N) fused [W1^T | W2^T]; b: (1, 2N) f32; o: (TB, N)."""
    n = o_ref.shape[-1]
    # Cast the activation tile to the weight dtype (no-op for f32 weights,
    # bf16 MXU-native mode on v6e/v7x when weights were fused as bf16).
    xv = x_ref[...].astype(w_ref.dtype)
    # ONE MXU matmul producing a lane-dense (TB, 2N) tile; accumulate in f32.
    y = jnp.dot(xv, w_ref[...], preferred_element_type=jnp.float32)
    # Bias add + maxout epilogue stay in f32 (v5e has no bf16 VPU).
    y = y + b_ref[...]
    o_ref[...] = jnp.maximum(y[:, :n], y[:, n:]).astype(o_ref.dtype)


def fuse_maxout_params(w1, b1, w2, b2, *, use_bf16=False):
    """One-time parameter prep (init-time, NOT per call).

    w1, w2: (N, K) in PyTorch nn.Linear layout; b1, b2: (N,).
    Returns fused (K, 2N) weight and (1, 2N) f32 bias.  With use_bf16=True the
    fused weight is stored in bfloat16 (v6e/v7x MXU-native; halves weight DMA);
    the bias stays f32 because the epilogue is always f32.
    """
    n = w1.shape[0]
    w_fused = jnp.concatenate([jnp.transpose(w1), jnp.transpose(w2)], axis=1)   # (K, 2N)
    b_fused = jnp.concatenate([b1, b2]).astype(jnp.float32).reshape(1, 2 * n)   # (1, 2N)
    if use_bf16:
        w_fused = w_fused.astype(jnp.bfloat16)
    return w_fused, b_fused


@functools.partial(jax.jit, static_argnames=("block_batch",))
def maxout_linear(x, w_fused, b_fused, *, block_batch=512):
    """x: (B, K); w_fused: (K, 2N); b_fused: (1, 2N) f32. Returns (B, N).

    Weights/bias are VMEM-resident across the whole batch grid (constant
    index_map); x/out tiles stream with automatic double-buffering.
    """
    B, K = x.shape
    two_n = w_fused.shape[1]
    N = two_n // 2

    # Batch tile: full batch when small, otherwise 256-512 rows per step.
    tb = B if B <= block_batch else block_batch
    grid = (pl.cdiv(B, tb),)

    # NOTE(production): if out_features >= 128, keep the output tile width a
    # multiple of 128 (unmasked vst); here N=64 == full array dim, masked store
    # is fully hidden at this size.
    cost = pl.CostEstimate(
        flops=2 * B * K * two_n + B * two_n + B * N,
        transcendentals=0,
        bytes_accessed=(x.size * x.dtype.itemsize
                        + w_fused.size * w_fused.dtype.itemsize
                        + b_fused.size * b_fused.dtype.itemsize
                        + B * N * x.dtype.itemsize),
    )

    return pl.pallas_call(
        maxout_linear_kernel,
        out_shape=jax.ShapeDtypeStruct((B, N), x.dtype),
        grid=grid,
        in_specs=[
            pl.BlockSpec((tb, K), lambda i: (i, 0)),        # streamed x tiles
            pl.BlockSpec((K, two_n), lambda i: (0, 0)),     # weights resident
            pl.BlockSpec((1, two_n), lambda i: (0, 0)),     # bias resident
        ],
        out_specs=pl.BlockSpec((tb, N), lambda i: (i, 0)),
        compiler_params=pltpu.CompilerParams(
            dimension_semantics=("parallel",),              # megacore on v7x
        ),
        cost_estimate=cost,
    )(x, w_fused, b_fused)


def reference_maxout_linear(x, w1, b1, w2, b2):
    y1 = x @ w1.T + b1
    y2 = x @ w2.T + b2
    return jnp.maximum(y1, y2)


if __name__ == "__main__":
    # Module config: in_features=32, out_features=64.
    in_features, out_features = 32, 64

    key = jax.random.PRNGKey(0)
    kx, kw1, kb1, kw2, kb2, kxl = jax.random.split(key, 6)

    # Deterministic init, mimicking nn.Linear's U(-1/sqrt(in), 1/sqrt(in)).
    bound = 1.0 / jnp.sqrt(jnp.float32(in_features))
    w1 = jax.random.uniform(kw1, (out_features, in_features), jnp.float32, -bound, bound)
    b1 = jax.random.uniform(kb1, (out_features,), jnp.float32, -bound, bound)
    w2 = jax.random.uniform(kw2, (out_features, in_features), jnp.float32, -bound, bound)
    b2 = jax.random.uniform(kb2, (out_features,), jnp.float32, -bound, bound)

    # ---- Small case (B=8), f32 weights, tight tolerance -------------------
    batch = 8
    x = jax.random.normal(kx, (batch, in_features), dtype=jnp.float32)

    w_fused, b_fused = fuse_maxout_params(w1, b1, w2, b2)       # init-time fusion
    w_fused = jax.block_until_ready(w_fused)
    b_fused = jax.block_until_ready(b_fused)

    out = jax.block_until_ready(maxout_linear(x, w_fused, b_fused))
    ref = reference_maxout_linear(x, w1, b1, w2, b2)
    assert out.shape == (batch, out_features)
    assert jnp.allclose(out, ref, atol=1e-5, rtol=1e-5), "mismatch vs reference (f32)"

    # ---- Larger batch exercising the grid + bf16 MXU path -----------------
    big_batch = 1024
    xl = jax.random.normal(kxl, (big_batch, in_features), dtype=jnp.float32)

    w_bf16, b_f32 = fuse_maxout_params(w1, b1, w2, b2, use_bf16=True)
    w_bf16 = jax.block_until_ready(w_bf16)
    b_f32 = jax.block_until_ready(b_f32)

    out_big = jax.block_until_ready(
        maxout_linear(xl, w_bf16, b_f32, block_batch=256))       # grid=(4,)
    ref_big = reference_maxout_linear(xl, w1, b1, w2, b2)
    assert out_big.shape == (big_batch, out_features)
    assert jnp.allclose(out_big, ref_big, atol=1e-2, rtol=1e-2), \
        "mismatch vs reference (bf16 MXU path)"

    print("KERNEL_OK")
</pallas_src>

<mosaic_0001>
module attributes {stable_mosaic.version = 11 : i64} {
  func.func @maxout_linear_kernel(%arg0: i32, %arg1: memref<8x32xf32, #tpu.memory_space<vmem>>, %arg2: memref<32x128xf32, #tpu.memory_space<vmem>>, %arg3: memref<1x128xf32, #tpu.memory_space<vmem>>, %arg4: memref<8x64xf32, #tpu.memory_space<vmem>>) attributes {dimension_semantics = [#tpu.dimension_semantics<parallel>], iteration_bounds = array<i64: 1>, scalar_prefetch = 0 : i64, scratch_operands = 0 : i64, tpu.core_type = #tpu.core_type<tc>, window_params = [{transform_indices = @transform_0, window_bounds = array<i64: 8, 32>}, {pipeline_mode = #tpu.pipeline_mode<synchronous>, transform_indices = @transform_1, window_bounds = array<i64: 32, 128>}, {pipeline_mode = #tpu.pipeline_mode<synchronous>, transform_indices = @transform_2, window_bounds = array<i64: 1, 128>}, {transform_indices = @transform_3, window_bounds = array<i64: 8, 64>}]} {
    %c0 = arith.constant 0 : index
    %c0_0 = arith.constant 0 : index
    %0 = vector.load %arg1[%c0, %c0_0] : memref<8x32xf32, #tpu.memory_space<vmem>>, vector<8x32xf32>
    %c0_1 = arith.constant 0 : index
    %c0_2 = arith.constant 0 : index
    %1 = vector.load %arg2[%c0_1, %c0_2] : memref<32x128xf32, #tpu.memory_space<vmem>>, vector<32x128xf32>
    %cst = arith.constant dense<0.000000e+00> : vector<8x128xf32>
    %2 = tpu.matmul %0, %1, %cst {dimension_numbers = #tpu.dot_dimension_numbers<[1], [0], [0], [1], [0, 0, 1, 1], [], []>} : vector<8x32xf32>, vector<32x128xf32>, vector<8x128xf32> -> vector<8x128xf32>
    %c0_3 = arith.constant 0 : index
    %c0_4 = arith.constant 0 : index
    %3 = vector.load %arg3[%c0_3, %c0_4] : memref<1x128xf32, #tpu.memory_space<vmem>>, vector<1x128xf32>
    %4 = vector.broadcast %3 : vector<1x128xf32> to vector<8x128xf32>
    %5 = arith.addf %2, %4 : vector<8x128xf32>
    %6 = vector.extract_strided_slice %5 {offsets = [0, 0], sizes = [8, 64], strides = [1, 1]} : vector<8x128xf32> to vector<8x64xf32>
    %7 = vector.extract_strided_slice %5 {offsets = [0, 64], sizes = [8, 64], strides = [1, 1]} : vector<8x128xf32> to vector<8x64xf32>
    %8 = arith.maximumf %6, %7 : vector<8x64xf32>
    %c0_5 = arith.constant 0 : index
    %c0_6 = arith.constant 0 : index
    %9 = vector.load %arg4[%c0_5, %c0_6] : memref<8x64xf32, #tpu.memory_space<vmem>>, vector<8x64xf32>
    tpu.vector_store %arg4[%c0_5, %c0_6], %8 {strides = array<i32>} : memref<8x64xf32, #tpu.memory_space<vmem>>, vector<8x64xf32>,
    return
  }
  func.func @transform_0(%arg0: i32) -> (i32, i32) {
    %c0_i32 = arith.constant 0 : i32
    %c0_i32_0 = arith.constant 0 : i32
    return %arg0, %c0_i32 : i32, i32
  }
  func.func @transform_1(%arg0: i32) -> (i32, i32) {
    %c0_i32 = arith.constant 0 : i32
    %c0_i32_0 = arith.constant 0 : i32
    %c0_i32_1 = arith.constant 0 : i32
    return %c0_i32, %c0_i32_0 : i32, i32
  }
  func.func @transform_2(%arg0: i32) -> (i32, i32) {
    %c0_i32 = arith.constant 0 : i32
    %c0_i32_0 = arith.constant 0 : i32
    %c0_i32_1 = arith.constant 0 : i32
    return %c0_i32, %c0_i32_0 : i32, i32
  }
  func.func @transform_3(%arg0: i32) -> (i32, i32) {
    %c0_i32 = arith.constant 0 : i32
    %c0_i32_0 = arith.constant 0 : i32
    return %arg0, %c0_i32 : i32, i32
  }
}

</mosaic_0001>

<bundles_post_ra>
// kernel: maxout_linear.1
= control target key start
LH: loop header
LB: loop body
LE: loop exit
PB: predicated region body
PF: predicated region fallthrough
CT: control target
= control target key end

     0   :  { %8 = vsyncpa [#allocation3], 0  ;;  %s282_s0 = inlined_call_operand.hbm [shape: f32[8,32], index: 0, kind: input, shape index: {}]   ;;  %s283_s1 = inlined_call_operand.hbm [shape: f32[32,128], index: 1, kind: input, shape index: {}]   ;;  %s284_s2 = inlined_call_operand.vmem [shape: f32[1,128], index: 2, kind: input, shape index: {}]   ;;  %s285_s3 = inlined_call_operand.hbm [shape: f32[8,64], index: 3, kind: output, shape index: {}]  }
   0x1   :  { %9 = vsyncpa [#allocation6], 0 }
   0x2   :  { %10 = vsyncpa [#allocation4], 0  ;;  %s242_s12 = smov [#allocation2]   ;;  %s243_s14 = smov [#allocation5]  }
   0x3   :  { %s17_s13 = sshll.u32 %s242_s12, 4  ;;  %s26_s15 = sshll.u32 %s243_s14, 4  ;;  %s18_s13 = int_to_ptr.vmem [resolvable:$true] %s17_s13  ;;  %s27_s15 = int_to_ptr.vmem [resolvable:$true] %s26_s15 }
   0x4   :  { %s184_s16 = scalar_lea.vmem %s18_s13, 128  ;;  %p189_p1 = scmp.lt.s32.totalorder %s18_s13, %s18_s13 }
   0x5   :  { %p185_p0 = scmp.ne.s32.totalorder %s18_s13, %s184_s16  ;;  %p190_p2 = scmp.lt.s32.totalorder %s184_s16, %s184_s16 }
   0x7   :  { %p191_p3 = por %p190_p2, %p189_p1 }
   0x9   :  { %p192_p4 = pnand %p191_p3, %p185_p0 }
   0xb   :  { %195 = shalt.err (!%p192_p4)
}
   0xc   :  { %20 = dma.hbm_to_vmem [thread:$0]  %s282_s0, 128, %s18_s13, [#allocation3]  }
   0xd   :  { %s204_s19 = scalar_lea.vmem %s27_s15, 512  ;;  %p209_p6 = scmp.lt.s32.totalorder %s27_s15, %s27_s15 }
   0xe   :  { %p205_p5 = scmp.ne.s32.totalorder %s27_s15, %s204_s19  ;;  %p210_p7 = scmp.lt.s32.totalorder %s204_s19, %s204_s19 }
  0x10   :  { %p211_p8 = por %p210_p7, %p209_p6 }
  0x12   :  { %p212_p9 = pnand %p211_p8, %p205_p5 }
  0x14   :  { %215 = shalt.err (!%p212_p9)
}
  0x15   :  { %s244_s20 = smov 128   ;;  %s245_s21 = smov 8  }
  0x16   :  { %32 = dma.hbm_to_vmem [thread:$0]  %s283_s1, 512, %s27_s15, [#allocation6], %s244_s20, %s244_s20, %s245_s21  }
  0x17   :  { %236 = dma.done.wait [#allocation3], 128  }
  0x18   :  { %237 = vsyncadd [#allocation3], 4294967168 }
  0x19   :  { %238 = dma.done.wait [#allocation6], 512  }
  0x1a   :  { %239 = vsyncadd [#allocation6], 4294966784  ;;  %v246_v0 = vmov 0.0   ;;  %vm247_vm0 = vmmov 0   ;;  %v45_v1 = vld [vmem:[#allocation5 + $0x18] sm:$0xff]  ;;  %v44_v2 = vld [vmem:[#allocation5 + $0x10] sm:$0xff] }
  0x1b   :  { %157 = vmatprep.subr.mxu0 %v246_v0  ;;  %165 = vmatprep.mubr.msk.f32.mxu0 %vm247_vm0, %v246_v0  ;;  %v43_v3 = vld [vmem:[#allocation5 + $0x8] sm:$0xff]  ;;  %v42_v4 = vld [vmem:[#allocation5] sm:$0xff]  ;;  %v41_v5 = vld [vmem:[#allocation2] sm:$0xff]  ;;  %vm53_vm1 = vcmask 261120   ;;  %s248_s24 = smov 64   ;;  %s249_s25 = smov [#allocation7]  }
  0x1c   :  { %158 = vmatpush3.msra.mxu0 %v45_v1  ;;  %v150_v6 = vld [vmem:[%s284_s2] ss:$0 sm:$0xff]  ;;  %s140_s26 = sshll.u32 %s249_s25, 4  ;;  %vm132_vm2 = vcmask 523264   ;;  %s141_s26 = int_to_ptr.vmem [resolvable:$true] %s140_s26 }
  0x1d   :  { %159 = vmatprep.subr.mxu0 %v246_v0  ;;  %s216_s27 = scalar_lea.vmem %s141_s26, 128  ;;  %p221_p11 = scmp.lt.s32.totalorder %s141_s26, %s141_s26 }
  0x1e   :  { %160 = vmatpush3.msra.mxu0 %v44_v2  ;;  %p217_p10 = scmp.ne.s32.totalorder %s141_s26, %s216_s27  ;;  %p222_p12 = scmp.lt.s32.totalorder %s216_s27, %s216_s27 }
  0x1f   :  { %161 = vmatprep.subr.mxu0 %v246_v0 }
  0x20   :  { %162 = vmatpush3.msra.mxu0 %v43_v3  ;;  %p223_p13 = por %p222_p12, %p221_p11 }
  0x21   :  { %163 = vmatprep.subr.mxu0 %v246_v0 }
  0x22   :  { %164 = vmatpush3.msra.mxu0 %v42_v4  ;;  %p224_p0 = pnand %p223_p13, %p217_p10 }
  0x23   :  { %166 = vmatmul.mubr.msk.f32.vlgmr.msra.gmra.mxu0 %vm53_vm1, %v41_v5 }
  0xe3   :  { %v123_v7 = vpop.f32.mrf.mxu0 }
  0xe4   :  { %v124_v8 = vadd.f32 %v150_v6, %v123_v7 }
  0xe5   :  { %v167_v9 = vpop.f32.mrf.mxu0 }
  0xe6   :  { %128 = vrot.lane.b32.xlu0 %v124_v8, %s248_s24 }
 0x158   :  { %v129_v10 = vpop.permute.xlu0 %128 }
 0x159   :  { %v131_v11 = vmax.f32 %v124_v8, %v129_v10 }
 0x15b   :  { %133 = vst.msk [vmem:[#allocation7] sm:$0xff] %vm132_vm2, %v131_v11 }
 0x15c   :  { %227 = shalt.err (!%p224_p0)
}
 0x15d   :  { %143 = dma.vmem_to_hbm [thread:$0]  %s141_s26, 128, %s285_s3, [#allocation4]  }
 0x15e   :  { %240 = dma.done.wait [#allocation4], 128  }
 0x15f   :  { %241 = vsyncadd [#allocation4], 4294967168 }
 0x160   :  { %147 = vsyncpa [#allocation3], 1 }
 0x161   :  { %148 = vsyncpa [#allocation6], 1 }
 0x162   :  { %149 = vsyncpa [#allocation4], 1 }

</bundles_post_ra>
